<compile_context>
chip_gen: v5e
topology: v5e:2x2
jax: 0.10.0
libtpu: 0.0.40
codegen_flags: <defaults>
</compile_context>

<pallas_src>
import functools
import math

import jax
import jax.numpy as jnp
from jax.experimental import pallas as pl
from jax.experimental.pallas import tpu as pltpu


def _t5_layernorm_kernel(x_ref, w_ref, o_ref, *, eps, true_hidden):
    # x_ref: (tm, Hp)   w_ref: (1, Hp)   o_ref: (tm, Hp)
    xf = x_ref[...].astype(jnp.float32)
    # Padded lane columns (if any) are zero, so sum / true_hidden == mean over
    # the original hidden axis.
    variance = jnp.sum(xf * xf, axis=-1, keepdims=True) * (1.0 / true_hidden)
    inv = jax.lax.rsqrt(variance + eps)                    # (tm, 1) f32, EUP
    # Normalize + scale in f32; single downcast at the store.
    o_ref[...] = (w_ref[...].astype(jnp.float32) * (xf * inv)).astype(o_ref.dtype)


def _vmem_capacity_bytes():
    """Physical VMEM of the attached TPU; conservative fallback if unknown."""
    try:
        return int(pltpu.get_tpu_info().vmem_capacity_bytes)
    except Exception:
        return 64 * 1024 * 1024  # v7x-sized (smallest current gen) fallback


def _num_tensorcores():
    """Best-effort TensorCores-per-chip query; 1 if unknown (v5e/v6e-safe)."""
    try:
        info = pltpu.get_tpu_info()
        for name in ("num_cores", "num_tensorcores", "tensorcore_count",
                     "cores_per_chip"):
            v = getattr(info, name, None)
            if isinstance(v, int) and v > 0:
                return v
    except Exception:
        pass
    return 1


def _round_down(x, m):
    return max(m, (x // m) * m)


def _per_row_vmem_bytes(hidden, itemsize):
    # Double-buffered input + output rows, plus (single-buffered) f32
    # temporaries from the in-kernel upcast / squared product.
    io_row = hidden * itemsize * 2                    # one input + one output row
    f32_tmp_row = hidden * 4 * (2 if itemsize < 4 else 1)
    return 2 * io_row + f32_tmp_row


def _choose_row_tile(rows, hidden, itemsize, row_tile, vmem_budget_frac,
                     target_tile_bytes=4 << 20):
    # Sublane packing multiple for the dtype: 8 (f32), 16 (bf16), 32 (int8/fp8).
    sub = max(8, 32 // max(1, itemsize))
    if rows <= sub:
        # Block equals the full row extent -> always a legal block shape.
        return rows

    if row_tile is not None:
        return _round_down(min(row_tile, rows), sub)

    # VMEM-feasible tile (f32 temporaries included).
    budget = int(_vmem_capacity_bytes() * vmem_budget_frac)
    tm_vmem = max(sub, budget // _per_row_vmem_bytes(hidden, itemsize))

    # Byte-target sizing: ~4 MiB input tiles sit at ~85%+ of the HBM roofline
    # and amortize the ~0.35 us/grid-step overhead, regardless of hidden size.
    tm_target = max(sub, target_tile_bytes // max(1, hidden * itemsize))

    tm = _round_down(min(rows, tm_target, tm_vmem), sub)

    # Megacore (v7x): only shrink the tile when the chip actually has >1
    # TensorCore AND shrinking keeps tiles >= ~1 MiB; v5e/v6e keep the maximal
    # tile (fewest grid steps).
    cores = _num_tensorcores()
    if cores > 1 and rows > tm:
        min_tile_rows = _round_down(
            max(sub, (1 << 20) // max(1, hidden * itemsize)), sub)
        while pl.cdiv(rows, tm) < cores and tm >= 2 * min_tile_rows:
            tm = _round_down(tm // 2, sub)
    return tm


def t5_layer_norm(x, weight, eps=1e-6, row_tile=None, vmem_budget_frac=0.3):
    """T5-style RMS LayerNorm. x: (..., hidden), weight: (hidden,)."""
    orig_shape = x.shape
    hidden = orig_shape[-1]
    rows = math.prod(orig_shape[:-1]) if len(orig_shape) > 1 else 1
    x2 = x.reshape(rows, hidden)
    w2 = weight.reshape(1, hidden)

    # Lane-dense padding: pad hidden up to a multiple of 128 (zero-pad).
    # Production T5 hiddens (512/768/1024/4096) take the no-pad path.
    h_pad = pl.cdiv(hidden, 128) * 128
    if h_pad != hidden:
        x2 = jnp.pad(x2, ((0, 0), (0, h_pad - hidden)))
        w2 = jnp.pad(w2, ((0, 0), (0, h_pad - hidden)))

    itemsize = x2.dtype.itemsize
    tm = _choose_row_tile(rows, h_pad, itemsize, row_tile, vmem_budget_frac)
    grid = pl.cdiv(rows, tm)   # ragged rows OK: last partial tile is masked

    # Scoped VMEM: what the chosen tile actually needs (+ resident weight and
    # headroom), clamped to ~0.7 of physical VMEM so Mosaic internal scratch
    # still fits on 64 MiB parts (v7x).
    cap = _vmem_capacity_bytes()
    needed = (tm * _per_row_vmem_bytes(h_pad, itemsize)
              + 2 * h_pad * w2.dtype.itemsize)
    vmem_limit = int(needed * 1.4) + (4 << 20)
    vmem_limit = max(16 << 20, min(vmem_limit, int(cap * 0.7)))

    kernel = functools.partial(_t5_layernorm_kernel, eps=eps, true_hidden=hidden)
    out = pl.pallas_call(
        kernel,
        out_shape=jax.ShapeDtypeStruct((rows, h_pad), x.dtype),
        grid_spec=pltpu.PrefetchScalarGridSpec(
            num_scalar_prefetch=0,
            grid=(grid,),
            in_specs=[
                pl.BlockSpec((tm, h_pad), lambda i: (i, 0)),
                pl.BlockSpec((1, h_pad), lambda i: (0, 0)),  # resident weight
            ],
            out_specs=pl.BlockSpec((tm, h_pad), lambda i: (i, 0)),
        ),
        compiler_params=pltpu.CompilerParams(
            dimension_semantics=("parallel",),
            vmem_limit_bytes=vmem_limit,
        ),
    )(x2, w2)

    if h_pad != hidden:
        out = out[:, :hidden]
    return out.reshape(orig_shape)


def _reference(x, weight, eps=1e-6):
    xf = x.astype(jnp.float32)
    variance = jnp.mean(xf * xf, axis=-1, keepdims=True)
    y = xf / jnp.sqrt(variance + eps)
    return (weight.astype(jnp.float32) * y).astype(x.dtype)


if __name__ == "__main__":
    key = jax.random.PRNGKey(0)

    # Small demo consistent with the module: (batch=2, seq=8, hidden=32).
    batch, seq, hidden = 2, 8, 32
    x = jax.random.normal(key, (batch, seq, hidden), dtype=jnp.float32)
    weight = jnp.ones((hidden,), dtype=jnp.float32)  # T5LayerNorm init = ones

    out = jax.block_until_ready(t5_layer_norm(x, weight, eps=1e-6))
    ref = _reference(x, weight, eps=1e-6)
    assert out.shape == x.shape and out.dtype == x.dtype
    assert jnp.allclose(out, ref, atol=1e-5, rtol=1e-5)

    # Ragged rows (15, not divisible by the row tile) exercise the masked
    # partial-last-tile path.
    x2 = jax.random.normal(jax.random.PRNGKey(1), (3, 5, hidden), dtype=jnp.float32)
    out2 = jax.block_until_ready(t5_layer_norm(x2, weight, eps=1e-6))
    assert jnp.allclose(out2, _reference(x2, weight, eps=1e-6), atol=1e-5, rtol=1e-5)

    # Lane-aligned hidden (multiple of 128) exercises the no-padding path.
    hidden3 = 256
    x3 = jax.random.normal(jax.random.PRNGKey(2), (2, 8, hidden3), dtype=jnp.float32)
    w3 = jax.random.normal(jax.random.PRNGKey(3), (hidden3,), dtype=jnp.float32)
    out3 = jax.block_until_ready(t5_layer_norm(x3, w3, eps=1e-6))
    assert jnp.allclose(out3, _reference(x3, w3, eps=1e-6), atol=1e-5, rtol=1e-5)

    print("KERNEL_OK")
</pallas_src>

<mosaic_0001>
module attributes {stable_mosaic.version = 11 : i64} {
  func.func @_t5_layernorm_kernel(%arg0: i32, %arg1: memref<16x128xf32, #tpu.memory_space<vmem>>, %arg2: memref<1x128xf32, #tpu.memory_space<vmem>>, %arg3: memref<16x128xf32, #tpu.memory_space<vmem>>) attributes {dimension_semantics = [#tpu.dimension_semantics<parallel>], iteration_bounds = array<i64: 1>, scalar_prefetch = 0 : i64, scratch_operands = 0 : i64, tpu.core_type = #tpu.core_type<tc>, window_params = [{transform_indices = @transform_0, window_bounds = array<i64: 16, 128>}, {pipeline_mode = #tpu.pipeline_mode<synchronous>, transform_indices = @transform_1, window_bounds = array<i64: 1, 128>}, {transform_indices = @transform_2, window_bounds = array<i64: 16, 128>}]} {
    %c0 = arith.constant 0 : index
    %c0_0 = arith.constant 0 : index
    %0 = vector.load %arg1[%c0, %c0_0] : memref<16x128xf32, #tpu.memory_space<vmem>>, vector<16x128xf32>
    %1 = arith.mulf %0, %0 : vector<16x128xf32>
    %cst = arith.constant dense<0.000000e+00> : vector<16xf32>
    %2 = vector.multi_reduction <add>, %1, %cst [1] : vector<16x128xf32> to vector<16xf32>
    %3 = vector.shape_cast %2 : vector<16xf32> to vector<16x1xf32>
    %cst_1 = arith.constant 3.125000e-02 : f32
    %4 = vector.broadcast %cst_1 : f32 to vector<16x1xf32>
    %5 = arith.mulf %3, %4 : vector<16x1xf32>
    %cst_2 = arith.constant 9.99999997E-7 : f32
    %6 = vector.broadcast %cst_2 : f32 to vector<16x1xf32>
    %7 = arith.addf %5, %6 : vector<16x1xf32>
    %8 = math.rsqrt %7 : vector<16x1xf32>
    %c0_3 = arith.constant 0 : index
    %c0_4 = arith.constant 0 : index
    %9 = vector.load %arg2[%c0_3, %c0_4] : memref<1x128xf32, #tpu.memory_space<vmem>>, vector<1x128xf32>
    %10 = vector.broadcast %8 : vector<16x1xf32> to vector<16x128xf32>
    %11 = arith.mulf %0, %10 : vector<16x128xf32>
    %12 = vector.broadcast %9 : vector<1x128xf32> to vector<16x128xf32>
    %13 = arith.mulf %12, %11 : vector<16x128xf32>
    %c0_5 = arith.constant 0 : index
    %c0_6 = arith.constant 0 : index
    %14 = vector.load %arg3[%c0_5, %c0_6] : memref<16x128xf32, #tpu.memory_space<vmem>>, vector<16x128xf32>
    tpu.vector_store %arg3[%c0_5, %c0_6], %13 {strides = array<i32>} : memref<16x128xf32, #tpu.memory_space<vmem>>, vector<16x128xf32>,
    return
  }
  func.func @transform_0(%arg0: i32) -> (i32, i32) {
    %c0_i32 = arith.constant 0 : i32
    %c0_i32_0 = arith.constant 0 : i32
    return %arg0, %c0_i32 : i32, i32
  }
  func.func @transform_1(%arg0: i32) -> (i32, i32) {
    %c0_i32 = arith.constant 0 : i32
    %c0_i32_0 = arith.constant 0 : i32
    %c0_i32_1 = arith.constant 0 : i32
    return %c0_i32, %c0_i32_0 : i32, i32
  }
  func.func @transform_2(%arg0: i32) -> (i32, i32) {
    %c0_i32 = arith.constant 0 : i32
    %c0_i32_0 = arith.constant 0 : i32
    return %arg0, %c0_i32 : i32, i32
  }
}

</mosaic_0001>

<bundles_post_ra>
// kernel: tpu_custom_call.1
= control target key start
LH: loop header
LB: loop body
LE: loop exit
PB: predicated region body
PF: predicated region fallthrough
CT: control target
= control target key end

     0   :  { %7 = vsyncpa [#allocation3], 0  ;;  %s227_s0 = inlined_call_operand.hbm [shape: f32[16,128], index: 0, kind: input, shape index: {}]   ;;  %s228_s1 = inlined_call_operand.hbm [shape: f32[1,128], index: 1, kind: input, shape index: {}]   ;;  %s229_s2 = inlined_call_operand.hbm [shape: f32[16,128], index: 2, kind: output, shape index: {}]  }
   0x1   :  { %8 = vsyncpa [#allocation6], 0 }
   0x2   :  { %9 = vsyncpa [#allocation4], 0  ;;  %s14_s11 = sshll.u32 %s227_s0, 4  ;;  %s192_s12 = smov [#allocation2]   ;;  %s15_s11 = int_to_ptr.hbm [resolvable:$true] %s14_s11 }
   0x3   :  { %s16_s13 = sshll.u32 %s192_s12, 4  ;;  %s28_s16 = sshll.u32 %s228_s1, 4  ;;  %s17_s13 = int_to_ptr.vmem [resolvable:$true] %s16_s13  ;;  %s29_s16 = int_to_ptr.hbm [resolvable:$true] %s28_s16 }
   0x4   :  { %s193_s17 = smov 128   ;;  %s194_s18 = smov 8  }
   0x5   :  { %22 = dma.hbm_to_vmem [thread:$0]  %s15_s11, 256, %s17_s13, [#allocation3], %s193_s17, %s193_s17, %s194_s18  }
   0x6   :  { %s195_s19 = smov [#allocation5]  }
   0x7   :  { %s30_s20 = sshll.u32 %s195_s19, 4  ;;  %s31_s20 = int_to_ptr.vmem [resolvable:$true] %s30_s20 }
   0x8   :  { %33 = dma.hbm_to_vmem [thread:$0]  %s29_s16, 16, %s31_s20, [#allocation6]  }
   0x9   :  { %186 = dma.done.wait [#allocation3], 256  }
   0xa   :  { %187 = vsyncadd [#allocation3], 4294967040 }
   0xb   :  { %188 = dma.done.wait [#allocation6], 16  }
   0xc   :  { %189 = vsyncadd [#allocation6], 4294967280  ;;  %v42_v0 = vld [vmem:[#allocation2] sm:$0xff]  ;;  %v43_v2 = vld [vmem:[#allocation2 + $0x8] sm:$0xff]  ;;  %s196_s0 = smov [#allocation7]   ;;  %s90_s23 = sshll.u32 %s229_s2, 4  ;;  %s91_s23 = int_to_ptr.hbm [resolvable:$true] %s90_s23 }
   0xd   :  { %v44_v1 = vmul.f32 %v42_v0, %v42_v0  ;;  %v45_v3 = vmul.f32 %v43_v2, %v43_v2  ;;  %v109_v18 = vld [vmem:[#allocation5] ss:$0 sm:$0xff]  ;;  %s88_s1 = sshll.u32 %s196_s0, 4  ;;  %s89_s1 = int_to_ptr.vmem [resolvable:$true] %s88_s1 }
   0xf   :  { %46 = vadd.xlane.f32.xlu0 %v44_v1 }
  0x17   :  { %48 = vadd.xlane.f32.xlu0 %v45_v3 }
  0x82   :  { %v47_v4 = vpop.xlane.xlu0 %46 }
  0x83   :  { %v50_v5 = vmul.f32 0.03125, %v47_v4 }
  0x85   :  { %v52_v6 = vadd.f32 1e-06, %v50_v5 }
  0x87   :  { %110 = vrsqrt.f32 %v52_v6  ;;  %vm60_vm1 = vweird.f32 %v52_v6 }
  0x8a   :  { %v49_v7 = vpop.xlane.xlu0 %48 }
  0x8b   :  { %v51_v8 = vmul.f32 0.03125, %v49_v7 }
  0x8d   :  { %v111_v9 = vpop.eup %110  ;;  %v53_v10 = vadd.f32 1e-06, %v51_v8 }
  0x8e   :  { %v55_v11 = vmul.f32 %v111_v9, %v52_v6  ;;  %vm61_vm0 = vweird.f32 %v111_v9 }
  0x8f   :  { %112 = vrsqrt.f32 %v53_v10  ;;  %vm62_vm2 = vmor %vm60_vm1, %vm61_vm0  ;;  %vm70_vm4 = vweird.f32 %v53_v10 }
  0x90   :  { %v56_v12 = vmul.f32 %v111_v9, %v55_v11 }
  0x92   :  { %v57_v13 = vmul.f32 0.5, %v56_v12 }
  0x94   :  { %v58_v14 = vsub.f32 1.5, %v57_v13 }
  0x95   :  { %v113_v15 = vpop.eup %112 }
  0x96   :  { %v59_v16 = vmul.f32 %v111_v9, %v58_v14  ;;  %v65_v17 = vmul.f32 %v113_v15, %v53_v10  ;;  %vm71_vm3 = vweird.f32 %v113_v15 }
  0x97   :  { %vm72_vm5 = vmor %vm70_vm4, %vm71_vm3 }
  0x98   :  { %v63_v19 = vsel %vm62_vm2, %v111_v9, %v59_v16  ;;  %v66_v20 = vmul.f32 %v113_v15, %v65_v17 }
  0x99   :  { %v75_v21 = vmul.f32 %v63_v19, %v42_v0 }
  0x9a   :  { %v67_v22 = vmul.f32 0.5, %v66_v20 }
  0x9b   :  { %v80_v23 = vmul.f32 %v109_v18, %v75_v21 }
  0x9c   :  { %v68_v24 = vsub.f32 1.5, %v67_v22 }
  0x9d   :  { %82 = vst [vmem:[#allocation7] sm:$0xff] %v80_v23 }
  0x9e   :  { %v69_v25 = vmul.f32 %v113_v15, %v68_v24 }
  0xa0   :  { %v73_v26 = vsel %vm72_vm5, %v113_v15, %v69_v25 }
  0xa1   :  { %v76_v27 = vmul.f32 %v73_v26, %v43_v2 }
  0xa3   :  { %v81_v28 = vmul.f32 %v109_v18, %v76_v27 }
  0xa5   :  { %83 = vst [vmem:[#allocation7 + $0x8] sm:$0xff] %v81_v28 }
  0xa6   :  { %96 = dma.vmem_to_hbm [thread:$0]  %s89_s1, 256, %s91_s23, [#allocation4], %s193_s17, %s193_s17, %s194_s18  }
  0xa7   :  { %190 = dma.done.wait [#allocation4], 256  }
  0xa8   :  { %191 = vsyncadd [#allocation4], 4294967040 }
  0xa9   :  { %101 = vsyncpa [#allocation3], 1 }
  0xaa   :  { %102 = vsyncpa [#allocation6], 1 }
  0xab   :  { %103 = vsyncpa [#allocation4], 1 }

</bundles_post_ra>
